<compile_context>
chip_gen: v7x
topology: tpu7x:2x2x1
jax: 0.10.0
libtpu: 0.0.40
codegen_flags: <defaults>
</compile_context>

<pallas_src>
import functools
import math

import jax
import jax.numpy as jnp
from jax import lax
from jax.experimental import pallas as pl
from jax.experimental.pallas import tpu as pltpu

_LANES = 128
_SUBLANES = 8


def _round_up(x, m):
    return -(-x // m) * m


def _vmem_limit_bytes():
    """Explicit scoped-VMEM limit with headroom below physical capacity."""
    cap = 64 * 1024 * 1024                      # conservative default (v7x per-TC VMEM)
    try:
        info = pltpu.get_tpu_info()
        cap = int(getattr(info, "vmem_capacity_bytes", cap)) or cap
    except Exception:
        pass
    # v5e/v6e (128 MiB physical) -> 96 MiB; v7x (64 MiB physical) -> 48 MiB.
    return min((cap * 3) // 4, 96 * 1024 * 1024)


def _pick_tiles(n_eff, c_eff, hw, itemsize, vmem_limit, tile_n=None, tile_s=None):
    """Jointly VMEM-budgeted (tile_n, tile_s, n_buffers).

    Preference order:
      1) full-HW contiguous blocks + batch grid >= 2 (v7x megacore),
      2) full-HW contiguous blocks,
      3) spatial split (128-multiple tiles, deeper buffering),
      4) smallest legal blocks (relies on vmem_limit_bytes; may spill).
    """
    c_pad = _round_up(c_eff, _SUBLANES)          # sublane-padded VMEM footprint
    reserve = 2 * 1024 * 1024                    # weights / bias / out / headroom
    per_block_cap = 16 * 1024 * 1024             # mem-bound sweet spot (4-16 MiB)

    def x_block_bytes(tn, ts):
        return tn * c_pad * _round_up(ts, _LANES) * itemsize

    def fits(tn, ts, nbuf):
        xb = x_block_bytes(tn, ts)
        acc = tn * c_pad * _LANES * 4
        return xb <= per_block_cap and nbuf * xb + acc + reserve <= vmem_limit

    if tile_n is None:
        divisors = [d for d in range(1, n_eff + 1) if n_eff % d == 0]
        # Legal output-block sublane sizes: multiples of 8, or the full extent.
        tn_cands = sorted({d for d in divisors if d % _SUBLANES == 0} | {n_eff})
    else:
        tn_cands = [tile_n]
    if tile_s is None:
        ts_cands = sorted({d for d in range(_LANES, hw + 1, _LANES) if hw % d == 0} | {hw})
    else:
        ts_cands = [tile_s]
    ts_full = max(ts_cands)

    for want_multi, allow_split in ((True, False), (False, False), (False, True)):
        found = []
        for tn in tn_cands:
            if want_multi and n_eff >= 2 and (n_eff // tn) < 2:
                continue
            for ts in ts_cands:
                if not allow_split and ts != ts_full:
                    continue
                nbuf = 2 if ts == hw else 3
                if fits(tn, ts, nbuf):
                    found.append((ts, tn))       # prefer big spatial, then big batch
        if found:
            ts, tn = max(found)
            return tn, ts, (2 if ts == hw else 3)
    # Nothing met the soft budget: smallest legal blocks, correctness preserved.
    tn, ts = min(tn_cands), min(ts_cands)
    return tn, ts, (2 if ts == hw else 3)


def _router_kernel(x_ref, w_ref, b_ref, o_ref, acc_ref, *, inv_hw):
    # x_ref: (TN, C, TS)   w_ref: (C, E)   b_ref: (1, E)
    # o_ref: (TN, E)       acc_ref: (TN, C, 128) fp32 scratch
    s_id = pl.program_id(1)
    tile_s = x_ref.shape[-1]
    n_chunks, rem = divmod(tile_s, _LANES)

    @pl.when(s_id == 0)
    def _init():
        acc_ref[...] = jnp.zeros_like(acc_ref)

    # Steady state: lane-blocked accumulation (pure vld + vadd); the cross-lane
    # XLU reduce, scaling and casts are all deferred to the finalize below.
    if n_chunks <= 8:
        for k in range(n_chunks):
            acc_ref[...] += x_ref[:, :, k * _LANES:(k + 1) * _LANES].astype(jnp.float32)
    else:
        def _chunk(k, carry):
            off = pl.multiple_of(k * _LANES, _LANES)
            acc_ref[...] += x_ref[:, :, pl.ds(off, _LANES)].astype(jnp.float32)
            return carry
        lax.fori_loop(0, n_chunks, _chunk, 0)

    if rem:
        # Ragged tail (< 128 lanes, only when tile_s == full H*W): reduce it
        # once and fold into lane 0 of the accumulator.
        tail = x_ref[:, :, n_chunks * _LANES:].astype(jnp.float32)
        tail_sum = jnp.sum(tail, axis=-1, keepdims=True)             # (TN, C, 1)
        lane = lax.broadcasted_iota(jnp.int32, acc_ref.shape, 2)
        acc_ref[...] += jnp.where(lane == 0, tail_sum, 0.0)

    @pl.when(s_id == pl.num_programs(1) - 1)
    def _finalize():
        # Single XLU cross-lane reduce + 1/(H*W) scale on the tiny pooled tensor.
        pooled = jnp.sum(acc_ref[...], axis=-1) * inv_hw             # (TN, C) f32
        logits = jnp.dot(pooled, w_ref[...].astype(jnp.float32),
                         preferred_element_type=jnp.float32)         # MXU
        logits = logits + b_ref[...].astype(jnp.float32)             # (1, E) bcast
        o_ref[...] = jax.nn.sigmoid(logits).astype(o_ref.dtype)


def sample_router(x, weight, bias, *, tile_n=None, tile_s=None):
    """SampleRouter.forward: global avg-pool -> Linear -> Sigmoid.

    x: (N, C, H, W) NCHW; weight: (E, C) nn.Linear layout; bias: (E,).
    Returns (N, E).
    """
    n, c, h, w = x.shape
    e = weight.shape[0]
    hw = h * w
    if weight.shape != (e, c) or bias.shape != (e,):
        raise ValueError("weight must be (num_experts, c_in) and bias (num_experts,)")

    # Channel grouping: when C is not a multiple of 8, fold g consecutive
    # samples into the channel (sublane) axis so VMEM tiles carry no sublane
    # padding.  Block-diagonal weight keeps grouped samples independent; the
    # reshapes are free (contiguous) views.
    g = 1
    if c % _SUBLANES != 0:
        g0 = _SUBLANES // math.gcd(c, _SUBLANES)
        if g0 > 1 and n % g0 == 0:
            g = g0
    n_eff, c_eff, e_eff = n // g, g * c, g * e

    x_g = x.reshape(n_eff, c_eff, hw)                       # free view
    w_t = jnp.transpose(weight)                             # (C, E)
    if g > 1:
        w_in = jnp.kron(jnp.eye(g, dtype=w_t.dtype), w_t)   # block-diag (gC, gE)
        b_in = jnp.tile(bias, g).reshape(1, e_eff)
    else:
        w_in = w_t
        b_in = bias.reshape(1, e)

    # Validate explicit tiles: no silent truncation of batch rows / spatial mean.
    if tile_s is not None and (hw % tile_s != 0 or (tile_s % _LANES != 0 and tile_s != hw)):
        raise ValueError(f"tile_s={tile_s} must divide H*W={hw} and be a multiple "
                         f"of {_LANES} (or equal H*W)")
    if tile_n is not None and (n_eff % tile_n != 0 or
                               (tile_n % _SUBLANES != 0 and tile_n != n_eff)):
        raise ValueError(f"tile_n={tile_n} must divide {n_eff} and be a multiple "
                         f"of {_SUBLANES} (or equal {n_eff})")

    vmem_limit = _vmem_limit_bytes()
    itemsize = jnp.dtype(x.dtype).itemsize
    tile_n, tile_s, n_buf = _pick_tiles(n_eff, c_eff, hw, itemsize, vmem_limit,
                                        tile_n=tile_n, tile_s=tile_s)

    grid = (n_eff // tile_n, hw // tile_s)

    x_map = lambda i, s: (i, 0, s)
    if n_buf > 2:
        # Spatially split blocks are strided HBM reads; deeper buffering hides
        # the extra DMA-descriptor issue latency.  Default 2 buffers otherwise.
        x_spec = pl.BlockSpec((tile_n, c_eff, tile_s), x_map,
                              pipeline_mode=pl.Buffered(n_buf))
    else:
        x_spec = pl.BlockSpec((tile_n, c_eff, tile_s), x_map)

    cost = pl.CostEstimate(
        flops=n * c * hw + 2 * n * c * e,
        transcendentals=n * e,
        bytes_accessed=(n * c * hw * itemsize + c * e * 4 + e * 4 + n * e * itemsize),
    )

    out_g = pl.pallas_call(
        functools.partial(_router_kernel, inv_hw=1.0 / float(hw)),
        out_shape=jax.ShapeDtypeStruct((n_eff, e_eff), x.dtype),
        grid_spec=pltpu.PrefetchScalarGridSpec(
            num_scalar_prefetch=0,
            grid=grid,
            in_specs=[
                x_spec,
                pl.BlockSpec((c_eff, e_eff), lambda i, s: (0, 0)),
                pl.BlockSpec((1, e_eff), lambda i, s: (0, 0)),
            ],
            out_specs=pl.BlockSpec((tile_n, e_eff), lambda i, s: (i, 0)),
            scratch_shapes=[pltpu.VMEM((tile_n, c_eff, _LANES), jnp.float32)],
        ),
        compiler_params=pltpu.CompilerParams(
            dimension_semantics=("parallel", "arbitrary"),
            vmem_limit_bytes=vmem_limit,
        ),
        cost_estimate=cost,
    )(x_g, w_in, b_in)

    return out_g.reshape(n, e)


def _reference(x, weight, bias):
    pooled = jnp.mean(x, axis=(2, 3))          # (N, C)
    return jax.nn.sigmoid(pooled @ weight.T + bias)


def _init_linear(key, c_in, num_experts):
    kw, kb = jax.random.split(key)
    bound = 1.0 / (c_in ** 0.5)
    weight = jax.random.uniform(kw, (num_experts, c_in),
                                minval=-bound, maxval=bound, dtype=jnp.float32)
    bias = jax.random.uniform(kb, (num_experts,),
                              minval=-bound, maxval=bound, dtype=jnp.float32)
    return weight, bias


if __name__ == "__main__":
    key = jax.random.PRNGKey(0)

    # Case 1: the module's toy config (C=4 < 8 exercises channel grouping).
    k1, k2, key = jax.random.split(key, 3)
    N, C, H, W, E = 2, 4, 16, 16, 8
    x = jax.random.normal(k1, (N, C, H, W), dtype=jnp.float32)
    weight, bias = _init_linear(k2, C, E)

    out = sample_router(x, weight, bias)
    jax.block_until_ready(out)
    ref = _reference(x, weight, bias)
    assert out.shape == (N, E)
    assert jnp.allclose(out, ref, atol=1e-5, rtol=1e-5), "mismatch vs reference"

    # Case 1b: force a spatially split multi-step reduction (accumulator
    # init/finalize across grid steps + Buffered(3) strided-DMA path).
    out_b = sample_router(x, weight, bias, tile_s=128)
    jax.block_until_ready(out_b)
    assert jnp.allclose(out_b, ref, atol=1e-5, rtol=1e-5), "tiled mismatch"

    # Case 2: C a multiple of 8 (no grouping), several batch tiles (megacore
    # preference), and H*W < 128 (exercises the ragged-tail path).
    k3, k4, key = jax.random.split(key, 3)
    N2, C2, H2, W2, E2 = 16, 16, 8, 8, 8
    x2 = jax.random.normal(k3, (N2, C2, H2, W2), dtype=jnp.float32)
    weight2, bias2 = _init_linear(k4, C2, E2)

    out2 = sample_router(x2, weight2, bias2)
    jax.block_until_ready(out2)
    ref2 = _reference(x2, weight2, bias2)
    assert out2.shape == (N2, E2)
    assert jnp.allclose(out2, ref2, atol=1e-5, rtol=1e-5), "case-2 mismatch"

    print("KERNEL_OK")
</pallas_src>

<mosaic_0001>
module attributes {stable_mosaic.version = 11 : i64} {
  func.func @_router_kernel(%arg0: i32, %arg1: i32, %arg2: memref<1x8x256xf32, #tpu.memory_space<vmem>>, %arg3: memref<8x16xf32, #tpu.memory_space<vmem>>, %arg4: memref<1x16xf32, #tpu.memory_space<vmem>>, %arg5: memref<1x16xf32, #tpu.memory_space<vmem>>, %arg6: memref<1x8x128xf32, #tpu.memory_space<vmem>>) attributes {dimension_semantics = [#tpu.dimension_semantics<parallel>, #tpu.dimension_semantics<arbitrary>], iteration_bounds = array<i64: 1, 1>, scalar_prefetch = 0 : i64, scratch_operands = 1 : i64, tpu.core_type = #tpu.core_type<tc>, window_params = [{transform_indices = @transform_0, window_bounds = array<i64: 1, 8, 256>}, {pipeline_mode = #tpu.pipeline_mode<synchronous>, transform_indices = @transform_1, window_bounds = array<i64: 8, 16>}, {pipeline_mode = #tpu.pipeline_mode<synchronous>, transform_indices = @transform_2, window_bounds = array<i64: 1, 16>}, {transform_indices = @transform_3, window_bounds = array<i64: 1, 16>}]} {
    %c0_i32 = arith.constant 0 : i32
    %0 = arith.cmpi eq, %arg1, %c0_i32 : i32
    %1 = arith.extui %0 : i1 to i32
    %c0_i32_0 = arith.constant 0 : i32
    %2 = arith.cmpi ne, %1, %c0_i32_0 : i32
    scf.if %2 {
      %cst = arith.constant 0.000000e+00 : f32
      %14 = vector.broadcast %cst : f32 to vector<1x8x128xf32>
      %c0_19 = arith.constant 0 : index
      %c0_20 = arith.constant 0 : index
      %c0_21 = arith.constant 0 : index
      %15 = vector.load %arg6[%c0_19, %c0_20, %c0_21] : memref<1x8x128xf32, #tpu.memory_space<vmem>>, vector<1x8x128xf32>
      tpu.vector_store %arg6[%c0_19, %c0_20, %c0_21], %14 {strides = array<i32>} : memref<1x8x128xf32, #tpu.memory_space<vmem>>, vector<1x8x128xf32>,
    } else {
    }
    %c0 = arith.constant 0 : index
    %c0_1 = arith.constant 0 : index
    %c0_2 = arith.constant 0 : index
    %3 = vector.load %arg6[%c0, %c0_1, %c0_2] : memref<1x8x128xf32, #tpu.memory_space<vmem>>, vector<1x8x128xf32>
    %c0_3 = arith.constant 0 : index
    %c0_4 = arith.constant 0 : index
    %c0_5 = arith.constant 0 : index
    %4 = vector.load %arg2[%c0_3, %c0_4, %c0_5] : memref<1x8x256xf32, #tpu.memory_space<vmem>>, vector<1x8x128xf32>
    %5 = arith.addf %3, %4 : vector<1x8x128xf32>
    %c0_6 = arith.constant 0 : index
    %c0_7 = arith.constant 0 : index
    %c0_8 = arith.constant 0 : index
    %6 = vector.load %arg6[%c0_6, %c0_7, %c0_8] : memref<1x8x128xf32, #tpu.memory_space<vmem>>, vector<1x8x128xf32>
    tpu.vector_store %arg6[%c0_6, %c0_7, %c0_8], %5 {strides = array<i32>} : memref<1x8x128xf32, #tpu.memory_space<vmem>>, vector<1x8x128xf32>,
    %c0_9 = arith.constant 0 : index
    %c0_10 = arith.constant 0 : index
    %c0_11 = arith.constant 0 : index
    %7 = vector.load %arg6[%c0_9, %c0_10, %c0_11] : memref<1x8x128xf32, #tpu.memory_space<vmem>>, vector<1x8x128xf32>
    %c0_12 = arith.constant 0 : index
    %c0_13 = arith.constant 0 : index
    %c128 = arith.constant 128 : index
    %8 = vector.load %arg2[%c0_12, %c0_13, %c128] : memref<1x8x256xf32, #tpu.memory_space<vmem>>, vector<1x8x128xf32>
    %9 = arith.addf %7, %8 : vector<1x8x128xf32>
    %c0_14 = arith.constant 0 : index
    %c0_15 = arith.constant 0 : index
    %c0_16 = arith.constant 0 : index
    %10 = vector.load %arg6[%c0_14, %c0_15, %c0_16] : memref<1x8x128xf32, #tpu.memory_space<vmem>>, vector<1x8x128xf32>
    tpu.vector_store %arg6[%c0_14, %c0_15, %c0_16], %9 {strides = array<i32>} : memref<1x8x128xf32, #tpu.memory_space<vmem>>, vector<1x8x128xf32>,
    %c0_i32_17 = arith.constant 0 : i32
    %11 = arith.cmpi eq, %arg1, %c0_i32_17 : i32
    %12 = arith.extui %11 : i1 to i32
    %c0_i32_18 = arith.constant 0 : i32
    %13 = arith.cmpi ne, %12, %c0_i32_18 : i32
    scf.if %13 {
      %c0_19 = arith.constant 0 : index
      %c0_20 = arith.constant 0 : index
      %c0_21 = arith.constant 0 : index
      %14 = vector.load %arg6[%c0_19, %c0_20, %c0_21] : memref<1x8x128xf32, #tpu.memory_space<vmem>>, vector<1x8x128xf32>
      %cst = arith.constant dense<0.000000e+00> : vector<1x8xf32>
      %15 = vector.multi_reduction <add>, %14, %cst [2] : vector<1x8x128xf32> to vector<1x8xf32>
      %cst_22 = arith.constant 3.906250e-03 : f32
      %16 = vector.broadcast %cst_22 : f32 to vector<1x8xf32>
      %17 = arith.mulf %15, %16 : vector<1x8xf32>
      %c0_23 = arith.constant 0 : index
      %c0_24 = arith.constant 0 : index
      %18 = vector.load %arg3[%c0_23, %c0_24] : memref<8x16xf32, #tpu.memory_space<vmem>>, vector<8x16xf32>
      %cst_25 = arith.constant dense<0.000000e+00> : vector<1x16xf32>
      %19 = tpu.matmul %17, %18, %cst_25 {dimension_numbers = #tpu.dot_dimension_numbers<[1], [0], [0], [1], [0, 0, 1, 1], [], []>} : vector<1x8xf32>, vector<8x16xf32>, vector<1x16xf32> -> vector<1x16xf32>
      %c0_26 = arith.constant 0 : index
      %c0_27 = arith.constant 0 : index
      %20 = vector.load %arg4[%c0_26, %c0_27] : memref<1x16xf32, #tpu.memory_space<vmem>>, vector<1x16xf32>
      %21 = arith.addf %19, %20 : vector<1x16xf32>
      %22 = arith.negf %21 : vector<1x16xf32>
      %23 = math.exp %22 : vector<1x16xf32>
      %cst_28 = arith.constant 1.000000e+00 : f32
      %24 = vector.broadcast %cst_28 : f32 to vector<1x16xf32>
      %25 = arith.addf %24, %23 : vector<1x16xf32>
      %26 = arith.divf %24, %25 : vector<1x16xf32>
      %c0_29 = arith.constant 0 : index
      %c0_30 = arith.constant 0 : index
      %27 = vector.load %arg5[%c0_29, %c0_30] : memref<1x16xf32, #tpu.memory_space<vmem>>, vector<1x16xf32>
      tpu.vector_store %arg5[%c0_29, %c0_30], %26 {strides = array<i32>} : memref<1x16xf32, #tpu.memory_space<vmem>>, vector<1x16xf32>,
    } else {
    }
    return
  }
  func.func @transform_0(%arg0: i32, %arg1: i32) -> (i32, i32, i32) {
    %c0_i32 = arith.constant 0 : i32
    %c0_i32_0 = arith.constant 0 : i32
    return %arg0, %c0_i32, %arg1 : i32, i32, i32
  }
  func.func @transform_1(%arg0: i32, %arg1: i32) -> (i32, i32) {
    %c0_i32 = arith.constant 0 : i32
    %c0_i32_0 = arith.constant 0 : i32
    %c0_i32_1 = arith.constant 0 : i32
    return %c0_i32, %c0_i32_0 : i32, i32
  }
  func.func @transform_2(%arg0: i32, %arg1: i32) -> (i32, i32) {
    %c0_i32 = arith.constant 0 : i32
    %c0_i32_0 = arith.constant 0 : i32
    %c0_i32_1 = arith.constant 0 : i32
    return %c0_i32, %c0_i32_0 : i32, i32
  }
  func.func @transform_3(%arg0: i32, %arg1: i32) -> (i32, i32) {
    %c0_i32 = arith.constant 0 : i32
    %c0_i32_0 = arith.constant 0 : i32
    return %arg0, %c0_i32 : i32, i32
  }
}

</mosaic_0001>

<bundles_post_ra>
// kernel: tpu_custom_call.1
= control target key start
LH: loop header
LB: loop body
LE: loop exit
PB: predicated region body
PF: predicated region fallthrough
CT: control target
= control target key end

     0   :  { %8 = vsyncpa [#allocation4], 0  ;;  %s319_s0 = inlined_call_operand.hbm [shape: f32[1,8,256], index: 0, kind: input, shape index: {}]   ;;  %s320_s1 = inlined_call_operand.hbm [shape: f32[8,16], index: 1, kind: input, shape index: {}]   ;;  %s321_s2 = inlined_call_operand.vmem [shape: f32[1,16], index: 2, kind: input, shape index: {}]   ;;  %s322_s3 = inlined_call_operand.hbm [shape: f32[1,16], index: 3, kind: output, shape index: {}]  }
   0x1   :  { %9 = vsyncpa [#allocation7], 0 }
   0x2   :  { %10 = vsyncpa [#allocation5], 0  ;;  %s255_s12 = smov [#allocation3]   ;;  %s256_s14 = smov [#allocation6]  }
   0x3   :  { %s17_s13 = sshll.u32 %s255_s12, 4  ;;  %s27_s15 = sshll.u32 %s256_s14, 4  ;;  %s18_s13 = int_to_ptr.vmem [resolvable:$true] %s17_s13  ;;  %s28_s15 = int_to_ptr.vmem [resolvable:$true] %s27_s15 }
   0x4   :  { %s183_s18 = scalar_lea.hbm %s319_s0, 256 }
   0x5   :  { %p184_p0 = scmp.ne.s32.totalorder %s319_s0, %s183_s18  ;;  %p187_p1 = scmp.lt.u32.totalorder %s183_s18, %s319_s0 }
   0x7   :  { %p189_p2 = pnand %p187_p1, %p184_p0 }
   0x9   :  { %192 = shalt.err (!%p189_p2)
}
   0xa   :  { %s193_s23 = scalar_lea.vmem %s18_s13, 256  ;;  %p198_p4 = scmp.lt.s32.totalorder %s18_s13, %s18_s13 }
   0xb   :  { %p194_p3 = scmp.ne.s32.totalorder %s18_s13, %s193_s23  ;;  %p199_p5 = scmp.lt.s32.totalorder %s193_s23, %s193_s23 }
   0xd   :  { %p200_p6 = por %p199_p5, %p198_p4 }
   0xf   :  { %p201_p7 = pnand %p200_p6, %p194_p3 }
  0x11   :  { %204 = shalt.err (!%p201_p7)
}
  0x12   :  { %20 = dma.hbm_to_vmem [thread:$0]  %s319_s0, 256, %s18_s13, [#allocation4]  }
  0x13   :  { %s205_s28 = scalar_lea.hbm %s320_s1, 128 }
  0x14   :  { %p206_p8 = scmp.ne.s32.totalorder %s320_s1, %s205_s28  ;;  %p209_p9 = scmp.lt.u32.totalorder %s205_s28, %s320_s1 }
  0x16   :  { %p211_p10 = pnand %p209_p9, %p206_p8 }
  0x18   :  { %214 = shalt.err (!%p211_p10)
}
  0x19   :  { %s215_s6 = scalar_lea.vmem %s28_s15, 128  ;;  %p220_p12 = scmp.lt.s32.totalorder %s28_s15, %s28_s15 }
  0x1a   :  { %p216_p11 = scmp.ne.s32.totalorder %s28_s15, %s215_s6  ;;  %p221_p13 = scmp.lt.s32.totalorder %s215_s6, %s215_s6 }
  0x1c   :  { %p222_p0 = por %p221_p13, %p220_p12 }
  0x1e   :  { %p223_p1 = pnand %p222_p0, %p216_p11 }
  0x20   :  { %226 = shalt.err (!%p223_p1)
}
  0x21   :  { %30 = dma.hbm_to_vmem [thread:$0]  %s320_s1, 128, %s28_s15, [#allocation7]  }
  0x22   :  { %249 = dma.done.wait [#allocation4], 256  }
  0x23   :  { %250 = vsyncadd [#allocation4], 4294967040 }
  0x24   :  { %251 = dma.done.wait [#allocation7], 128  }
  0x25   :  { %252 = vsyncadd [#allocation7], 4294967168  ;;  %v45_v0 = vld [vmem:[#allocation3] sm:$0xff]  ;;  %v49_v1 = vld [vmem:[#allocation3 + $0x8] sm:$0xff]  ;;  %v257_v3 = vmov 0.0   ;;  %vm258_vm0 = vmmov 0   ;;  %v62_v5 = vlaneseq }
  0x26   :  { %v50_v2 = vadd.f32 %v49_v1, %v45_v0  ;;  %169 = vmatprep.subr.mxu0 %v257_v3  ;;  %v59_v4 = vld [vmem:[#allocation6] sm:$0xff]  ;;  %171 = vmatprep.mubr.msk.f32.mxu0 %vm258_vm0, %v257_v3  ;;  %vm68_vm1 = vcmask 64512   ;;  %v60_v12 = vld [vmem:[%s321_s2] sm:$0x1]  ;;  %s259_s9 = smov [#allocation8]   ;;  %vm147_vm2 = vcmask 122880  }
  0x27   :  { %170 = vmatpush3.msra.mxu0 %v59_v4  ;;  %v63_v6 = vand.u32 127, %v62_v5  ;;  %v65_v7 = vshrl.u32 %v62_v5, 7  ;;  %s155_s10 = sshll.u32 %s259_s9, 4  ;;  %s156_s10 = int_to_ptr.vmem [resolvable:$true] %s155_s10 }
  0x28   :  { %56 = vadd.xlane.f32.xlu0 %v50_v2  ;;  %s227_s11 = scalar_lea.vmem %s156_s10, 16  ;;  %s231_s12 = scalar_lea.vmem %s156_s10, 32 }
  0x29   :  { %v66_v8 = vsub.s32 %v63_v6, %v65_v7  ;;  %p228_p2 = scmp.ne.s32.totalorder %s156_s10, %s227_s11  ;;  %p232_p3 = scmp.lt.s32.totalorder %s156_s10, %s156_s10 }
  0x2a   :  { %p233_p4 = scmp.lt.s32.totalorder %s231_s12, %s227_s11 }
  0x2c   :  { %p234_p5 = por %p233_p4, %p232_p3 }
  0x2e   :  { %p235_p6 = pnand %p234_p5, %p228_p2 }
  0xb5   :  { %v57_v9 = vpop.xlane.xlu0 %56 }
  0xb6   :  { %v58_v10 = vmul.f32 0.00390625, %v57_v9 }
  0xb8   :  { %v67_v11 = vrot.slane %v58_v10, %v66_v8 }
  0xba   :  { %172 = vmatmul.mubr.msk.f32.vlgmr.msra.gmra.mrb[0].mxu0 %vm68_vm1, %v67_v11 }
 0x18d   :  { %v137_v13 = vpop.f32.mrb[0].mxu0 }
 0x18e   :  { %v138_v14 = vadd.f32 %v137_v13, %v60_v12  ;;  %v173_v15 = vpop.f32.mrb[1].mxu0 }
 0x190   :  { %v166_v16 = vmul.f32 -1.442695, %v138_v14 }
 0x192   :  { %179 = vpow2.f32 %v166_v16 }
 0x19c   :  { %v180_v17 = vpop.eup %179 }
 0x19d   :  { %v144_v18 = vadd.f32 1.0, %v180_v17 }
 0x19f   :  { %181 = vrcp.f32 %v144_v18 }
 0x1a9   :  { %v182_v19 = vpop.eup %181 }
 0x1aa   :  { %148 = vst.msk [vmem:[#allocation8] sm:$0x1] %vm147_vm2, %v182_v19 }
 0x1ab   :  { %238 = shalt.err (!%p235_p6)
}
 0x1ac   :  { %s239_s14 = scalar_lea.hbm %s322_s3, 16 }
 0x1ad   :  { %p240_p7 = scmp.ne.s32.totalorder %s322_s3, %s239_s14  ;;  %p243_p8 = scmp.lt.u32.totalorder %s239_s14, %s322_s3 }
 0x1af   :  { %p245_p9 = pnand %p243_p8, %p240_p7 }
 0x1b1   :  { %248 = shalt.err (!%p245_p9)
}
 0x1b2   :  { %158 = dma.vmem_to_hbm [thread:$0]  %s156_s10, 16, %s322_s3, [#allocation5]  }
 0x1b3   :  { %253 = dma.done.wait [#allocation5], 16  }
 0x1b4   :  { %254 = vsyncadd [#allocation5], 4294967280 }
 0x1b5   :  { %162 = vsyncpa [#allocation4], 1 }
 0x1b6   :  { %163 = vsyncpa [#allocation7], 1 }
 0x1b7   :  { %164 = vsyncpa [#allocation5], 1 }

</bundles_post_ra>
